<compile_context>
chip_gen: v5e
topology: v5e:2x2
jax: 0.10.0
libtpu: 0.0.40
codegen_flags: <defaults>
</compile_context>

<pallas_src>
import jax
import jax.numpy as jnp
from jax.experimental import pallas as pl
from jax.experimental.pallas import tpu as pltpu


def residual_ff_kernel(x_ref, w1_ref, b1_ref, w2_ref, b2_ref, o_ref):
    # x_ref : (tm, D) f32 token tile (residual path kept in f32)
    # w1_ref: (D, H) bf16, b1_ref: (1, H) f32
    # w2_ref: (H, D) bf16, b2_ref: (1, D) f32
    # NOTE: when M % tm != 0 the padded rows of the last block flow through the
    # GELU on junk data and are masked at the store; do not add unmasked
    # reductions over this tile.
    x = x_ref[...]
    # bf16 into the MXU, f32 accumulation.
    h = jnp.dot(x.astype(jnp.bfloat16), w1_ref[...],
                preferred_element_type=jnp.float32)          # (tm, H) f32
    # Bias + tanh-GELU in bf16: tanh goes to the EUP slot, bf16 halves VALU
    # work / vreg pressure on v6e/v7x. Second matmul consumes bf16 anyway.
    hb = (h + b1_ref[...]).astype(jnp.bfloat16)
    hb = jax.nn.gelu(hb, approximate=True)
    y = jnp.dot(hb, w2_ref[...], preferred_element_type=jnp.float32)
    # Residual: fn(x) + x, fused with the second bias add in one epilogue pass.
    o_ref[...] = (y + (b2_ref[...] + x)).astype(o_ref.dtype)


def _broadcast_spec(shape):
    """Constant (weight/bias) block: same tile every grid step -> single buffer."""
    index_map = lambda i: (0,) * len(shape)
    try:
        return pl.BlockSpec(shape, index_map, pipeline_mode=pl.Buffered(1))
    except (TypeError, AttributeError):
        # Older Pallas without pipeline_mode / Buffered: default double
        # buffering (the VMEM estimate below already budgets for this).
        return pl.BlockSpec(shape, index_map)


def _vmem_capacity_bytes():
    """Physical VMEM of the current chip; conservative 64 MiB fallback."""
    try:
        return int(pltpu.get_tpu_info().vmem_capacity_bytes)
    except Exception:
        return 64 << 20


def _choose_tm(M, tm_req, min_steps=8):
    """Token-tile rows: multiple of 8, deep even grid so v7x's 2 TCs stay fed."""
    tm = max(8, min(tm_req, M))
    tm = (tm // 8) * 8
    # Deepen the grid to >= min_steps (>= min_steps/2 per v7x core) when the
    # token count allows, without dropping below 64-row tiles.
    while -(-M // tm) < min_steps and tm >= 128:
        tm //= 2
    # Prefer an even number of steps so the parallel axis splits evenly.
    steps = -(-M // tm)
    if steps > 1 and steps % 2 == 1:
        cand = tm - 8
        while cand >= 8:
            if (-(-M // cand)) % 2 == 0:
                tm = cand
                break
            cand -= 8
    return tm


def residual_feedforward(x, w1, b1, w2, b2, *, tm=None):
    """y = FeedForward(x) + x, fused in one Pallas kernel.

    Pass w1 / w2 already in bf16 (pre-cast once at parameter setup) to avoid a
    per-call HBM round trip for the cast.
    """
    B, N, D = x.shape
    H = w1.shape[1]
    M = B * N

    phys_vmem = _vmem_capacity_bytes()
    # Generation-aware defaults: bigger tiles on the 128 MiB parts (v5e/v6e),
    # smaller on the 64 MiB part (v7x).
    if tm is None:
        tm = 512 if phys_vmem >= (96 << 20) else 256
    tm = _choose_tm(M, tm)

    x2 = x.reshape(M, D)
    w1b = w1 if w1.dtype == jnp.bfloat16 else w1.astype(jnp.bfloat16)
    w2b = w2 if w2.dtype == jnp.bfloat16 else w2.astype(jnp.bfloat16)
    b1_2 = b1.reshape(1, H).astype(jnp.float32)
    b2_2 = b2.reshape(1, D).astype(jnp.float32)

    grid = (pl.cdiv(M, tm),)

    # --- VMEM budget ---------------------------------------------------------
    # Exactly-known buffers at face value; weights budgeted as if the
    # Buffered(1) request fell back to double buffering (worst case).
    out_itemsize = jnp.dtype(x.dtype).itemsize
    bytes_io_tiles = 2 * tm * D * 4 + 2 * tm * D * out_itemsize      # x + out, double buffered
    bytes_weights = 2 * (D * H * 2 + H * 4 + H * D * 2 + D * 4)      # bf16 W1/W2 + f32 biases, x2
    bytes_temps = tm * H * 4 + tm * H * 2 + tm * D * 4               # h f32, h bf16, y f32
    est = bytes_io_tiles + bytes_weights + 2 * bytes_temps           # headroom only on temps
    # Cap: leave real headroom under physical VMEM (v7x: 64 -> ~52 MiB;
    # v5e/v6e: 128 -> 100 MiB).
    cap = min(phys_vmem - (12 << 20), 100 << 20)
    vmem_limit = int(min(max(est + (16 << 20), 32 << 20), cap))

    out = pl.pallas_call(
        residual_ff_kernel,
        out_shape=jax.ShapeDtypeStruct((M, D), x.dtype),
        grid_spec=pltpu.PrefetchScalarGridSpec(
            num_scalar_prefetch=0,
            grid=grid,
            in_specs=[
                pl.BlockSpec((tm, D), lambda i: (i, 0)),   # x tile (pipelined)
                _broadcast_spec((D, H)),                   # W1 (bf16, resident)
                _broadcast_spec((1, H)),                   # b1
                _broadcast_spec((H, D)),                   # W2 (bf16, resident)
                _broadcast_spec((1, D)),                   # b2
            ],
            out_specs=pl.BlockSpec((tm, D), lambda i: (i, 0)),
        ),
        compiler_params=pltpu.CompilerParams(
            dimension_semantics=("parallel",),
            vmem_limit_bytes=vmem_limit),
    )(x2, w1b, b1_2, w2b, b2_2)
    return out.reshape(B, N, D)


def reference(x, w1, b1, w2, b2):
    # f32 reference for the same instantiated fn (tanh-approximate GELU).
    h = jnp.dot(x, w1) + b1
    h = jax.nn.gelu(h, approximate=True)
    y = jnp.dot(h, w2) + b2
    return y + x


if __name__ == "__main__":
    key = jax.random.PRNGKey(0)
    # Small but lane-dense shapes: D, H multiples of 128.
    B, N, D, H = 2, 256, 128, 256   # batch, seq, hidden, mlp-hidden

    kx, k1, k2, k3, k4 = jax.random.split(key, 5)
    x = jax.random.normal(kx, (B, N, D), dtype=jnp.float32)
    # Deterministic synthetic parameter init for the wrapped fn.
    w1_f32 = jax.random.normal(k1, (D, H), dtype=jnp.float32) * 0.02
    b1 = jax.random.normal(k2, (H,), dtype=jnp.float32) * 0.02
    w2_f32 = jax.random.normal(k3, (H, D), dtype=jnp.float32) * 0.02
    b2 = jax.random.normal(k4, (D,), dtype=jnp.float32) * 0.02

    # Pre-cast the weights to bf16 ONCE at parameter setup (not per call).
    w1_bf16 = w1_f32.astype(jnp.bfloat16)
    w2_bf16 = w2_f32.astype(jnp.bfloat16)

    out = residual_feedforward(x, w1_bf16, b1, w2_bf16, b2)
    out = jax.block_until_ready(out)

    ref = reference(x, w1_f32, b1, w2_f32, b2)
    assert out.shape == x.shape and out.dtype == x.dtype
    # bf16 matmul/GELU path vs f32 reference: loosened tolerance.
    assert jnp.allclose(out, ref, atol=2e-2, rtol=2e-2), (
        float(jnp.max(jnp.abs(out - ref))))
    print("KERNEL_OK")
</pallas_src>

<mosaic_0001>
module attributes {stable_mosaic.version = 11 : i64} {
  func.func @residual_ff_kernel(%arg0: i32, %arg1: memref<64x128xf32, #tpu.memory_space<vmem>>, %arg2: memref<128x256xbf16, #tpu.memory_space<vmem>>, %arg3: memref<1x256xf32, #tpu.memory_space<vmem>>, %arg4: memref<256x128xbf16, #tpu.memory_space<vmem>>, %arg5: memref<1x128xf32, #tpu.memory_space<vmem>>, %arg6: memref<64x128xf32, #tpu.memory_space<vmem>>) attributes {dimension_semantics = [#tpu.dimension_semantics<parallel>], iteration_bounds = array<i64: 8>, scalar_prefetch = 0 : i64, scratch_operands = 0 : i64, tpu.core_type = #tpu.core_type<tc>, window_params = [{transform_indices = @transform_0, window_bounds = array<i64: 64, 128>}, {pipeline_mode = #tpu.pipeline_mode<synchronous>, transform_indices = @transform_1, window_bounds = array<i64: 128, 256>}, {pipeline_mode = #tpu.pipeline_mode<synchronous>, transform_indices = @transform_2, window_bounds = array<i64: 1, 256>}, {pipeline_mode = #tpu.pipeline_mode<synchronous>, transform_indices = @transform_3, window_bounds = array<i64: 256, 128>}, {pipeline_mode = #tpu.pipeline_mode<synchronous>, transform_indices = @transform_4, window_bounds = array<i64: 1, 128>}, {transform_indices = @transform_5, window_bounds = array<i64: 64, 128>}]} {
    %c0 = arith.constant 0 : index
    %c0_0 = arith.constant 0 : index
    %0 = vector.load %arg1[%c0, %c0_0] : memref<64x128xf32, #tpu.memory_space<vmem>>, vector<64x128xf32>
    %1 = arith.truncf %0 : vector<64x128xf32> to vector<64x128xbf16>
    %c0_1 = arith.constant 0 : index
    %c0_2 = arith.constant 0 : index
    %2 = vector.load %arg2[%c0_1, %c0_2] : memref<128x256xbf16, #tpu.memory_space<vmem>>, vector<128x256xbf16>
    %cst = arith.constant dense<0.000000e+00> : vector<64x256xf32>
    %3 = tpu.matmul %1, %2, %cst {dimension_numbers = #tpu.dot_dimension_numbers<[1], [0], [0], [1], [0, 0, 1, 1], [], []>} : vector<64x128xbf16>, vector<128x256xbf16>, vector<64x256xf32> -> vector<64x256xf32>
    %c0_3 = arith.constant 0 : index
    %c0_4 = arith.constant 0 : index
    %4 = vector.load %arg3[%c0_3, %c0_4] : memref<1x256xf32, #tpu.memory_space<vmem>>, vector<1x256xf32>
    %5 = vector.broadcast %4 : vector<1x256xf32> to vector<64x256xf32>
    %6 = arith.addf %3, %5 : vector<64x256xf32>
    %7 = arith.truncf %6 : vector<64x256xf32> to vector<64x256xbf16>
    %8 = arith.mulf %7, %7 : vector<64x256xbf16>
    %9 = arith.mulf %7, %8 : vector<64x256xbf16>
    %cst_5 = arith.constant 4.467770e-02 : bf16
    %10 = vector.broadcast %cst_5 : bf16 to vector<64x256xbf16>
    %11 = arith.mulf %10, %9 : vector<64x256xbf16>
    %12 = arith.addf %7, %11 : vector<64x256xbf16>
    %cst_6 = arith.constant 7.968750e-01 : bf16
    %13 = vector.broadcast %cst_6 : bf16 to vector<64x256xbf16>
    %14 = arith.mulf %13, %12 : vector<64x256xbf16>
    %15 = math.tanh %14 : vector<64x256xbf16>
    %cst_7 = arith.constant 1.000000e+00 : bf16
    %16 = vector.broadcast %cst_7 : bf16 to vector<64x256xbf16>
    %17 = arith.addf %16, %15 : vector<64x256xbf16>
    %cst_8 = arith.constant 5.000000e-01 : bf16
    %18 = vector.broadcast %cst_8 : bf16 to vector<64x256xbf16>
    %19 = arith.mulf %18, %17 : vector<64x256xbf16>
    %20 = arith.mulf %7, %19 : vector<64x256xbf16>
    %c0_9 = arith.constant 0 : index
    %c0_10 = arith.constant 0 : index
    %21 = vector.load %arg4[%c0_9, %c0_10] : memref<256x128xbf16, #tpu.memory_space<vmem>>, vector<256x128xbf16>
    %cst_11 = arith.constant dense<0.000000e+00> : vector<64x128xf32>
    %22 = tpu.matmul %20, %21, %cst_11 {dimension_numbers = #tpu.dot_dimension_numbers<[1], [0], [0], [1], [0, 0, 1, 1], [], []>} : vector<64x256xbf16>, vector<256x128xbf16>, vector<64x128xf32> -> vector<64x128xf32>
    %c0_12 = arith.constant 0 : index
    %c0_13 = arith.constant 0 : index
    %23 = vector.load %arg5[%c0_12, %c0_13] : memref<1x128xf32, #tpu.memory_space<vmem>>, vector<1x128xf32>
    %24 = vector.broadcast %23 : vector<1x128xf32> to vector<64x128xf32>
    %25 = arith.addf %24, %0 : vector<64x128xf32>
    %26 = arith.addf %22, %25 : vector<64x128xf32>
    %c0_14 = arith.constant 0 : index
    %c0_15 = arith.constant 0 : index
    %27 = vector.load %arg6[%c0_14, %c0_15] : memref<64x128xf32, #tpu.memory_space<vmem>>, vector<64x128xf32>
    tpu.vector_store %arg6[%c0_14, %c0_15], %26 {strides = array<i32>} : memref<64x128xf32, #tpu.memory_space<vmem>>, vector<64x128xf32>,
    return
  }
  func.func @transform_0(%arg0: i32) -> (i32, i32) {
    %c0_i32 = arith.constant 0 : i32
    %c0_i32_0 = arith.constant 0 : i32
    return %arg0, %c0_i32 : i32, i32
  }
  func.func @transform_1(%arg0: i32) -> (i32, i32) {
    %c0_i32 = arith.constant 0 : i32
    %c0_i32_0 = arith.constant 0 : i32
    %c0_i32_1 = arith.constant 0 : i32
    return %c0_i32, %c0_i32_0 : i32, i32
  }
  func.func @transform_2(%arg0: i32) -> (i32, i32) {
    %c0_i32 = arith.constant 0 : i32
    %c0_i32_0 = arith.constant 0 : i32
    %c0_i32_1 = arith.constant 0 : i32
    return %c0_i32, %c0_i32_0 : i32, i32
  }
  func.func @transform_3(%arg0: i32) -> (i32, i32) {
    %c0_i32 = arith.constant 0 : i32
    %c0_i32_0 = arith.constant 0 : i32
    %c0_i32_1 = arith.constant 0 : i32
    return %c0_i32, %c0_i32_0 : i32, i32
  }
  func.func @transform_4(%arg0: i32) -> (i32, i32) {
    %c0_i32 = arith.constant 0 : i32
    %c0_i32_0 = arith.constant 0 : i32
    %c0_i32_1 = arith.constant 0 : i32
    return %c0_i32, %c0_i32_0 : i32, i32
  }
  func.func @transform_5(%arg0: i32) -> (i32, i32) {
    %c0_i32 = arith.constant 0 : i32
    %c0_i32_0 = arith.constant 0 : i32
    return %arg0, %c0_i32 : i32, i32
  }
}

</mosaic_0001>

<bundles_post_ra>
// kernel: tpu_custom_call.1
= control target key start
LH: loop header
LB: loop body
LE: loop exit
PB: predicated region body
PF: predicated region fallthrough
CT: control target
= control target key end

     0   :  { %10 = vsyncpa [#allocation3], 0  ;;  %s2055_s0 = inlined_call_operand.hbm [shape: f32[512,128], index: 0, kind: input, shape index: {}]   ;;  %s2056_s1 = inlined_call_operand.hbm [shape: bf16[128,256], index: 1, kind: input, shape index: {}]   ;;  %s2057_s2 = inlined_call_operand.hbm [shape: f32[1,256], index: 2, kind: input, shape index: {}]   ;;  %s2058_s3 = inlined_call_operand.hbm [shape: bf16[256,128], index: 3, kind: input, shape index: {}]   ;;  %s2059_s4 = inlined_call_operand.vmem [shape: f32[1,128], index: 4, kind: input, shape index: {}]   ;;  %s2060_s5 = inlined_call_operand.hbm [shape: f32[512,128], index: 5, kind: output, shape index: {}]  }
   0x1   :  { %12 = vsyncpa [#allocation3 + $0x1], 0 }
   0x2   :  { %13 = vsyncpa [#allocation6], 0 }
   0x3   :  { %14 = vsyncpa [#allocation9], 0 }
   0x4   :  { %15 = vsyncpa [#allocation4], 0 }
   0x5   :  { %17 = vsyncpa [#allocation4 + $0x1], 0  ;;  %s1692_s18 = smov 0   ;;  %s1694_s19 = smov 0  }
   0x6   :  { %s1696_s20 = smov 0   ;;  %s1698_s21 = smov 0  }
   0x7 LB: > { %s1713_s22 = sadd.s32 4294967295, %s1651_s21   ;;  %s1159_s23 = sadd.s32 4294967294, %s1651_s21   ;;  %s1651_s21 = sphi %s1698_s21, %s2072_s21   ;;  %s1647_s20 = sphi %s1696_s20, %s2071_s20   ;;  %s1643_s19 = sphi %s1694_s19, %s2070_s19   ;;  %s1639_s18 = sphi %s1692_s18, %s2069_s18  }
   0x8   : > { %p43_p0 = scmp.ne.s32.totalorder %s1643_s19, %s1639_s18  ;;  %p44_p1 = scmp.eq.s32.totalorder %s1713_s22, 0 }
   0x9   : > { %p151_p2 = scmp.eq.s32.totalorder %s1713_s22, 7  ;;  %p157_p3 = scmp.eq.s32.totalorder %s1159_s23, 7 }
   0xa   : > { %p1722_p4 = por %p44_p1, %p43_p0  ;;  %p1160_p5 = scmp.ge.s32.totalorder %s1651_s21, 1 }
   0xb   : > { %p1727_p6 = por %p157_p3, %p43_p0  ;;  %p164_p7 = scmp.lt.s32.totalorder %s1651_s21, 9 }
   0xc   : > { %s175_s28 = sshll.u32 %s2056_s1, 4  ;;  %s1653_s30 = smov [#allocation5]   ;;  %s176_s28 = int_to_ptr.hbm [resolvable:$true] %s175_s28 }
   0xd   : > { %p1735_p8 = pnand %p1160_p5, %p164_p7  ;;  %s177_s6 = sshll.u32 %s1653_s30, 4  ;;  %s178_s6 = int_to_ptr.vmem [resolvable:$true] %s177_s6 }
   0xe   : > { %s190_s10 = sshll.u32 %s2057_s2, 4  ;;  %s2061_s11 = smov 128   ;;  %s191_s10 = int_to_ptr.hbm [resolvable:$true] %s190_s10 }
   0xf   : > { %p1357_p9 = pneg %p1735_p8  ;;  %s1655_s12 = smov 8  }
  0x10   : > { %s1656_s13 = smov [#allocation7]   ;;  %s201_s17 = sshll.u32 %s2058_s3, 4  ;;  %s202_s17 = int_to_ptr.hbm [resolvable:$true] %s201_s17 }
  0x11   : > { %p1743_p10 = pnand %p1357_p9, %p44_p1  ;;  %s192_s14 = sshll.u32 %s1656_s13, 4  ;;  %s193_s14 = int_to_ptr.vmem [resolvable:$true] %s192_s14 }
  0x12   : > { %s1657_s23 = smov [#allocation8]   ;;  %s1658_s27 = smov 64  }
  0x13   : > { %1360 = dma.hbm_to_vmem [thread:$0]  (!%p1743_p10), %s176_s28, 2048, %s178_s6, [#allocation6], %s2061_s11, %s2061_s11, %s1655_s12  }
  0x14   : > { %1363 = dma.hbm_to_vmem [thread:$0]  (!%p1743_p10), %s191_s10, 32, %s193_s14, [#allocation6]  }
  0x15   : > { %s203_s26 = sshll.u32 %s1657_s23, 4  ;;  %s1659_s28 = smov 4   ;;  %s204_s26 = int_to_ptr.vmem [resolvable:$true] %s203_s26 }
  0x16   : > { %1366 = dma.hbm_to_vmem [thread:$0]  (!%p1743_p10), %s202_s17, 2048, %s204_s26, [#allocation9], %s1658_s27, %s1658_s27, %s1659_s28  }
  0x17   : > { %s1763_s30 = sadd.s32 1, %s1651_s21   ;;  %s30_s8 = sadd.s32 1, %s1647_s20 }
  0x18   : > { %s27_s6 = ssub.s32 %s1651_s21, %s1763_s30  ;;  %p37_p12 = scmp.ne.s32.totalorder %s1647_s20, %s1643_s19 }
  0x19   : > { %p28_p11 = scmp.eq.s32.totalorder %s27_s6, 0  ;;  %p38_p13 = scmp.eq.s32.totalorder %s1651_s21, 0 }
  0x1a   : > { %p1776_p0 = por %p151_p2, %p37_p12  ;;  %p1378_p3 = scmp.lt.s32.totalorder %s1651_s21, 8 }
  0x1b   : > { %s1772_s9 = scalar_select %p28_p11, %s1647_s20, %s30_s8  }
  0x1c   : > { %s220_s13 = sand.u32 1, %s1647_s20   ;;  %s1307_s14 = sshll.u32 %s1651_s21, 6 }
  0x1d   : > { %p39_p5 = por %p38_p13, %p37_p12  ;;  %s1165_s7 = sshll.u32 %s220_s13, 6 }
  0x1e   : > { %s229_s17 = scalar_lea.hbm %s2055_s0, %s1307_s14  ;;  %s224_s26 = scalar_lea.vmem [#allocation2], %s1165_s7 }
  0x1f   : > { %s230_s23 = sshll.u32 %s229_s17, 4  ;;  %s232_s27 = sshll.u32 %s224_s26, 4  ;;  %s231_s23 = int_to_ptr.hbm [resolvable:$true] %s230_s23  ;;  %s233_s27 = int_to_ptr.vmem [resolvable:$true] %s232_s27 }
  0x20   : > { %p1786_p7 = pnand %p1378_p3, %p39_p5  ;;  %s221_s6 = scalar_lea.sflag [#allocation3], %s220_s13 }
  0x21   : > { %s1547_s8 = sshra.s32 %s231_s23, 4  ;;  %s1554_s7 = scalar_lea.hbm %s2055_s0, 512  ;;  %s1548_s8 = int_to_ptr.hbm [resolvable:$true] %s1547_s8 }
  0x22   : > { %s1549_s11 = scalar_lea.hbm %s1548_s8, 64  ;;  %p1551_p9 = pneg %p1786_p7 }
  0x23   : > { %p1550_p2 = scmp.ne.s32.totalorder %s1548_s8, %s1549_s11  ;;  %p1555_p12 = scmp.lt.s32.totalorder %s1548_s8, %s2055_s0 }
  0x24   : > { %p1556_p13 = scmp.lt.s32.totalorder %s1554_s7, %s1549_s11 }
  0x25   : > { %p1552_p10 = pnand %p1551_p9, %p1550_p2 }
  0x26   : > { %p1557_p3 = por %p1556_p13, %p1555_p12 }
  0x27   : > { %p1553_p11 = pneg %p1552_p10 }
  0x29   : > { %p1558_p5 = pnand %p1557_p3, %p1553_p11 }
  0x2b   : > { %1561 = shalt.err (!%p1558_p5)
}
  0x2c   : > { %s2068_s13 = smov 128   ;;  %244 = sbr.rel (%p1735_p8) target bundleno = 499 (0x1f3), region = 40 }
  0x2d   : > { %1370 = dma.hbm_to_vmem [thread:$0]  (!%p1786_p7), %s231_s23, 1024, %s233_s27, %s221_s6, %s2068_s13, %s2068_s13, %s1655_s12  }
  0x2e   : > { %s1806_s26 = sand.u32 (!%p1735_p8), 1, %s1643_s19  }
  0x2f   : > { %s1169_s11 = sshll.u32 (!%p1735_p8), %s1806_s26, 6  ;;  %s247_s8 = scalar_lea.sflag (!%p1735_p8), [#allocation3], %s1806_s26 }
  0x30   : > { %s1812_s14 = scalar_lea.vmem (!%p1735_p8), [#allocation2], %s1169_s11 }
  0x31   : > { %1622 = dma.done.wait (%p1722_p4), %s247_s8, 1024  }
  0x32   : > { %1624 = vsyncadd (%p1722_p4), %s247_s8, 4294966272 }
  0x33   : > { %1626 = dma.done.wait (%p44_p1), [#allocation6], 2080  }
  0x34   : > { %1628 = vsyncadd (%p44_p1), [#allocation6], 4294965216 }
  0x35   : > { %1630 = dma.done.wait (%p44_p1), [#allocation9], 2048  }
  0x36   : > { %1632 = vsyncadd (%p44_p1), [#allocation9], 4294965248  ;;  %v1232_v0 = vld [vmem:[#allocation5 + $0x70] sm:$0xf]  ;;  %v1323_v1 = vld [vmem:[#allocation5 + $0x74] sm:$0xf0] }
  0x37   : > { %v1322_v2 = vld [vmem:[#allocation5 + $0x74] sm:$0xf]  ;;  %v1233_v3 = vor.u32 %v1323_v1, %v1232_v0  ;;  %v1234_v4 = vld [vmem:[#allocation5 + $0x78] sm:$0xf0]  ;;  %v1224_v5 = vld [vmem:[#allocation5 + $0x60] sm:$0xf] }
  0x38   : > { %v1321_v6 = vld [vmem:[#allocation5 + $0x64] sm:$0xf0]  ;;  %v1237_v7 = vor.u32 %v1322_v2, %v1234_v4  ;;  %v1320_v8 = vld [vmem:[#allocation5 + $0x64] sm:$0xf]  ;;  %v1226_v9 = vld [vmem:[#allocation5 + $0x68] sm:$0xf0] }
  0x39   : > { %409 = vmatpush.bf16.msra.mxu0 %v1233_v3  ;;  %v1225_v10 = vor.u32 %v1321_v6, %v1224_v5  ;;  %v1229_v11 = vor.u32 %v1320_v8, %v1226_v9  ;;  %v1216_v12 = vld [vmem:[#allocation5 + $0x50] sm:$0xf]  ;;  %v1319_v13 = vld [vmem:[#allocation5 + $0x54] sm:$0xf0]  ;;  %v1318_v14 = vld [vmem:[#allocation5 + $0x54] sm:$0xf] }
  0x3a   : > { %438 = vmatpush.bf16.msra.mxu1 %v1237_v7  ;;  %v1218_v15 = vld [vmem:[#allocation5 + $0x58] sm:$0xf0]  ;;  %v1217_v16 = vor.u32 %v1319_v13, %v1216_v12  ;;  %v1208_v18 = vld [vmem:[#allocation5 + $0x40] sm:$0xf]  ;;  %v1317_v19 = vld [vmem:[#allocation5 + $0x44] sm:$0xf0] }
  0x3b   : > { %v1221_v17 = vor.u32 %v1318_v14, %v1218_v15  ;;  %v1316_v20 = vld [vmem:[#allocation5 + $0x44] sm:$0xf]  ;;  %v1210_v21 = vld [vmem:[#allocation5 + $0x48] sm:$0xf0]  ;;  %v1209_v22 = vor.u32 %v1317_v19, %v1208_v18  ;;  %v1200_v24 = vld [vmem:[#allocation5 + $0x30] sm:$0xf] }
  0x3c   : > { %v1213_v23 = vor.u32 %v1316_v20, %v1210_v21  ;;  %v1315_v25 = vld [vmem:[#allocation5 + $0x34] sm:$0xf0]  ;;  %v1314_v26 = vld [vmem:[#allocation5 + $0x34] sm:$0xf]  ;;  %v1202_v27 = vld [vmem:[#allocation5 + $0x38] sm:$0xf0] }
  0x3d   : > { %410 = vmatpush.bf16.msra.mxu0 %v1225_v10  ;;  %v1201_v28 = vor.u32 %v1315_v25, %v1200_v24  ;;  %v1205_v29 = vor.u32 %v1314_v26, %v1202_v27  ;;  %v1192_v30 = vld [vmem:[#allocation5 + $0x20] sm:$0xf]  ;;  %v1313_v31 = vld [vmem:[#allocation5 + $0x24] sm:$0xf0]  ;;  %v1312_v32 = vld [vmem:[#allocation5 + $0x24] sm:$0xf] }
  0x3e   : > { %439 = vmatpush.bf16.msra.mxu1 %v1229_v11  ;;  %v1194_v33 = vld [vmem:[#allocation5 + $0x28] sm:$0xf0]  ;;  %v1193_v34 = vor.u32 %v1313_v31, %v1192_v30  ;;  %v1184_v36 = vld [vmem:[#allocation5 + $0x10] sm:$0xf]  ;;  %v1311_v37 = vld [vmem:[#allocation5 + $0x14] sm:$0xf0] }
  0x3f   : > { %v1197_v35 = vor.u32 %v1312_v32, %v1194_v33  ;;  %v1310_v38 = vld [vmem:[#allocation5 + $0x14] sm:$0xf]  ;;  %v1186_v39 = vld [vmem:[#allocation5 + $0x18] sm:$0xf0]  ;;  %v1185_v40 = vor.u32 %v1311_v37, %v1184_v36  ;;  %v1176_v42 = vld [vmem:[#allocation5] sm:$0xf] }
  0x40   : > { %v1189_v41 = vor.u32 %v1310_v38, %v1186_v39  ;;  %v1309_v43 = vld [vmem:[#allocation5 + $0x4] sm:$0xf0]  ;;  %v1308_v44 = vld [vmem:[#allocation5 + $0x4] sm:$0xf]  ;;  %v1178_v45 = vld [vmem:[#allocation5 + $0x8] sm:$0xf0] }
  0x41   : > { %411 = vmatpush.bf16.msra.mxu0 %v1217_v16  ;;  %v1177_v46 = vor.u32 %v1309_v43, %v1176_v42  ;;  %v1827_v47 = vld [vmem:[%s1812_s14] sm:$0xff]  ;;  %v1830_v48 = vld [vmem:[%s1812_s14 + $0x8] sm:$0xff]  ;;  %v1181_v49 = vor.u32 %v1308_v44, %v1178_v45  ;;  %v1835_v51 = vld [vmem:[%s1812_s14 + $0x10] sm:$0xff]  ;;  %s2005_s12 = scalar_lea.vmem [#allocation10], %s1169_s11  ;;  %s1340_s23 = sshll.u32 %s1713_s22, 6 }
  0x42   : > { %440 = vmatpush.bf16.msra.mxu1 %v1221_v17  ;;  %v303_v50 = vpack.c.bf16 %v1830_v48, %v1827_v47  ;;  %v1838_v52 = vld [vmem:[%s1812_s14 + $0x18] sm:$0xff]  ;;  %v1843_v54 = vld [vmem:[%s1812_s14 + $0x20] sm:$0xff]  ;;  %v1846_v55 = vld [vmem:[%s1812_s14 + $0x28] sm:$0xff]  ;;  %s1053_s6 = scalar_lea.hbm %s2060_s5, %s1340_s23  ;;  %s1054_s15 = sshll.u32 %s2005_s12, 4  ;;  %s1055_s15 = int_to_ptr.vmem [resolvable:$true] %s1054_s15 }
  0x43   : > { %v304_v53 = vpack.c.bf16 %v1838_v52, %v1835_v51  ;;  %v305_v56 = vpack.c.bf16 %v1846_v55, %v1843_v54  ;;  %v1851_v57 = vld [vmem:[%s1812_s14 + $0x30] sm:$0xff]  ;;  %v1854_v58 = vld [vmem:[%s1812_s14 + $0x38] sm:$0xff]  ;;  %v323_v60 = vld [vmem:[#allocation7] sm:$0x3]  ;;  %s1056_s7 = sshll.u32 %s1053_s6, 4  ;;  %s1042_s16 = scalar_lea.sflag [#allocation4], %s1806_s26  ;;  %s1057_s7 = int_to_ptr.hbm [resolvable:$true] %s1056_s7 }
  0x44   : > { %v306_v59 = vpack.c.bf16 %v1854_v58, %v1851_v57  ;;  %v1858_v61 = vperm.slane %v323_v60, 0  ;;  %v1860_v62 = vperm.slane %v323_v60, 1  ;;  %v1331_v13 = vld [vmem:[#allocation8 + $0x38] sm:$0xff]  ;;  %v1329_v38 = vld [vmem:[#allocation8 + $0x28] sm:$0xff]  ;;  %s1591_s22 = sshra.s32 %s1057_s7, 4  ;;  %s1597_s8 = scalar_lea.hbm %s2060_s5, 512  ;;  %s1592_s22 = int_to_ptr.hbm [resolvable:$true] %s1591_s22 }
  0x45   : > { %412 = vmatpush.bf16.msra.mxu0 %v1209_v22  ;;  %v1339_v14 = vld [vmem:[#allocation8 + $0x78] sm:$0xff]  ;;  %975 = vmatpush.bf16.msra.mxu2 %v1331_v13  ;;  %v1330_v22 = vld [vmem:[#allocation8 + $0x30] sm:$0xff]  ;;  %v1337_v39 = vld [vmem:[#allocation8 + $0x68] sm:$0xff]  ;;  %s1593_s17 = scalar_lea.hbm %s1592_s22, 64  ;;  %p1598_p7 = scmp.lt.s32.totalorder %s1592_s22, %s2060_s5 }
  0x46   : > { %441 = vmatpush.bf16.msra.mxu1 %v1213_v23  ;;  %1004 = vmatpush.bf16.msra.mxu3 %v1339_v14  ;;  %v1338_v23 = vld [vmem:[#allocation8 + $0x70] sm:$0xff]  ;;  %v1327_v13 = vld [vmem:[#allocation8 + $0x18] sm:$0xff]  ;;  %p1594_p1 = scmp.ne.s32.totalorder %s1592_s22, %s1593_s17  ;;  %p1599_p2 = scmp.lt.s32.totalorder %s1597_s8, %s1593_s17 }
  0x47   : > { %v1335_v14 = vld [vmem:[#allocation8 + $0x58] sm:$0xff] }
  0x48   : > { %p1595_p4 = pnand %p1594_p1, %p1776_p0  ;;  %p1600_p9 = por %p1599_p2, %p1598_p7 }
  0x49   : > { %413 = vmatpush.bf16.msra.mxu0 %v1201_v28  ;;  %976 = vmatpush.bf16.msra.mxu2 %v1330_v22 }
  0x4a   : > { %442 = vmatpush.bf16.msra.mxu1 %v1205_v29  ;;  %1005 = vmatpush.bf16.msra.mxu3 %v1338_v23  ;;  %p1596_p8 = pneg %p1595_p4 }
  0x4c   : > { %p1601_p10 = pnand %p1600_p9, %p1596_p8 }
  0x4d   : > { %414 = vmatpush.bf16.msra.mxu0 %v1193_v34  ;;  %977 = vmatpush.bf16.msra.mxu2 %v1329_v38 }
  0x4e   : > { %443 = vmatpush.bf16.msra.mxu1 %v1197_v35  ;;  %1006 = vmatpush.bf16.msra.mxu3 %v1337_v39 }
  0x51   : > { %415 = vmatpush.bf16.msra.mxu0 %v1185_v40 }
  0x52   : > { %444 = vmatpush.bf16.msra.mxu1 %v1189_v41 }
  0x55   : > { %416 = vmatpush.bf16.msra.mxu0 %v1177_v46 }
  0x56   : > { %445 = vmatpush.bf16.msra.mxu1 %v1181_v49 }
  0x58   : > { %417 = vmatmul.bf16.vlgmr.msra.gmra.mxu0 %v303_v50 }
  0x59   : > { %446 = vmatmul.bf16.vlgmr.msra.gmra.mxu1 %v303_v50 }
  0x68   : > { %422 = vmatmul.bf16.gmra.mxu0 %v304_v53 }
  0x69   : > { %451 = vmatmul.bf16.gmra.mxu1 %v304_v53 }
  0x78   : > { %427 = vmatmul.bf16.gmra.mxu0 %v305_v56 }
  0x79   : > { %456 = vmatmul.bf16.gmra.mxu1 %v305_v56  ;;  %v1328_v56 = vld [vmem:[#allocation8 + $0x20] sm:$0xff] }
  0x7a   : > { %978 = vmatpush.bf16.msra.mxu2 %v1328_v56 }
  0x7e   : > { %979 = vmatpush.bf16.msra.mxu2 %v1327_v13 }
  0x88   : > { %432 = vmatmul.bf16.gmra.mxu0 %v306_v59 }
  0x89   : > { %461 = vmatmul.bf16.gmra.mxu1 %v306_v59  ;;  %v1336_v59 = vld [vmem:[#allocation8 + $0x60] sm:$0xff] }
  0x8a   : > { %1007 = vmatpush.bf16.msra.mxu3 %v1336_v59  ;;  %v1325_v59 = vld [vmem:[#allocation8 + $0x8] sm:$0xff] }
  0x8e   : > { %1008 = vmatpush.bf16.msra.mxu3 %v1335_v14 }
  0xd5   : > { %v418_v63 = vpop.f32.mrf.mxu0 }
  0xd6   : > { %v419_v0 = vadd.f32 %v418_v63, %v1858_v61  ;;  %v447_v1 = vpop.f32.mrf.mxu1 }
  0xd7   : > { %v448_v2 = vadd.f32 %v447_v1, %v1860_v62 }
  0xd9   : > { %v467_v3 = vpack.c.bf16 %v448_v2, %v419_v0 }
  0xdb   : > { %v1864_v4 = vunpack.c.l.bf16 %v467_v3  ;;  %v1866_v5 = vunpack.c.h.bf16 %v467_v3 }
  0xdd   : > { %v491_v6 = vmul.f32 %v1864_v4, %v1864_v4  ;;  %v492_v7 = vmul.f32 %v1866_v5, %v1866_v5  ;;  %v420_v8 = vpop.f32.mrf.mxu0 }
  0xde   : > { %v421_v9 = vadd.f32 %v420_v8, %v1858_v61  ;;  %v449_v10 = vpop.f32.mrf.mxu1 }
  0xdf   : > { %v507_v11 = vpack.c.bf16 %v492_v7, %v491_v6  ;;  %v450_v12 = vadd.f32 %v449_v10, %v1860_v62 }
  0xe1   : > { %v515_v15 = vunpack.c.l.bf16 %v507_v11  ;;  %v516_v16 = vunpack.c.h.bf16 %v507_v11  ;;  %v468_v17 = vpack.c.bf16 %v450_v12, %v421_v9 }
  0xe3   : > { %v531_v18 = vmul.f32 %v515_v15, %v1864_v4  ;;  %v532_v19 = vmul.f32 %v516_v16, %v1866_v5  ;;  %v1876_v20 = vunpack.c.l.bf16 %v468_v17  ;;  %v1878_v21 = vunpack.c.h.bf16 %v468_v17 }
  0xe5   : > { %v547_v24 = vpack.c.bf16 %v532_v19, %v531_v18  ;;  %v493_v25 = vmul.f32 %v1876_v20, %v1876_v20  ;;  %v494_v26 = vmul.f32 %v1878_v21, %v1878_v21  ;;  %v423_v27 = vpop.f32.mrf.mxu0 }
  0xe6   : > { %v424_v28 = vadd.f32 %v423_v27, %v1858_v61  ;;  %v452_v29 = vpop.f32.mrf.mxu1 }
  0xe7   : > { %v555_v30 = vunpack.c.l.bf16 %v547_v24  ;;  %v556_v31 = vunpack.c.h.bf16 %v547_v24  ;;  %v508_v32 = vpack.c.bf16 %v494_v26, %v493_v25  ;;  %v453_v33 = vadd.f32 %v452_v29, %v1860_v62 }
  0xe9   : > { %v571_v34 = vmul.f32 0.044677734, %v555_v30  ;;  %v572_v35 = vmul.f32 0.044677734, %v556_v31  ;;  %v517_v36 = vunpack.c.l.bf16 %v508_v32  ;;  %v518_v37 = vunpack.c.h.bf16 %v508_v32  ;;  %v1326_v32 = vld [vmem:[#allocation8 + $0x10] sm:$0xff] }
  0xea   : > { %v469_v40 = vpack.c.bf16 %v453_v33, %v424_v28  ;;  %v1334_v33 = vld [vmem:[#allocation8 + $0x50] sm:$0xff]  ;;  %980 = vmatpush.bf16.msra.mxu2 %v1326_v32 }
  0xeb   : > { %v587_v41 = vpack.c.bf16 %v572_v35, %v571_v34  ;;  %v533_v42 = vmul.f32 %v517_v36, %v1876_v20  ;;  %v534_v43 = vmul.f32 %v518_v37, %v1878_v21  ;;  %1009 = vmatpush.bf16.msra.mxu3 %v1334_v33 }
  0xec   : > { %v1888_v44 = vunpack.c.l.bf16 %v469_v40  ;;  %v1890_v45 = vunpack.c.h.bf16 %v469_v40 }
  0xed   : > { %v595_v46 = vunpack.c.l.bf16 %v587_v41  ;;  %v596_v49 = vunpack.c.h.bf16 %v587_v41  ;;  %v548_v50 = vpack.c.bf16 %v534_v43, %v533_v42  ;;  %v425_v53 = vpop.f32.mrf.mxu0 }
  0xee   : > { %v495_v60 = vmul.f32 %v1888_v44, %v1888_v44  ;;  %v496_v63 = vmul.f32 %v1890_v45, %v1890_v45  ;;  %v426_v0 = vadd.f32 %v425_v53, %v1858_v61  ;;  %v454_v1 = vpop.f32.mrf.mxu1  ;;  %981 = vmatpush.bf16.msra.mxu2 %v1325_v59 }
  0xef   : > { %v611_v2 = vadd.f32 %v595_v46, %v1864_v4  ;;  %v612_v3 = vadd.f32 %v596_v49, %v1866_v5  ;;  %v557_v6 = vunpack.c.l.bf16 %v548_v50  ;;  %v558_v7 = vunpack.c.h.bf16 %v548_v50 }
  0xf0   : > { %v509_v8 = vpack.c.bf16 %v496_v63, %v495_v60  ;;  %v455_v9 = vadd.f32 %v454_v1, %v1860_v62  ;;  %v1333_v60 = vld [vmem:[#allocation8 + $0x48] sm:$0xff] }
  0xf1   : > { %v627_v10 = vpack.c.bf16 %v612_v3, %v611_v2  ;;  %v573_v11 = vmul.f32 0.044677734, %v557_v6  ;;  %v574_v12 = vmul.f32 0.044677734, %v558_v7  ;;  %1010 = vmatpush.bf16.msra.mxu3 %v1333_v60 }
  0xf2   : > { %v519_v15 = vunpack.c.l.bf16 %v509_v8  ;;  %v520_v16 = vunpack.c.h.bf16 %v509_v8  ;;  %v470_v17 = vpack.c.bf16 %v455_v9, %v426_v0 }
  0xf3   : > { %v635_v18 = vunpack.c.l.bf16 %v627_v10  ;;  %v636_v19 = vunpack.c.h.bf16 %v627_v10  ;;  %v588_v22 = vpack.c.bf16 %v574_v12, %v573_v11 }
  0xf4   : > { %v535_v23 = vmul.f32 %v519_v15, %v1888_v44  ;;  %v536_v24 = vmul.f32 %v520_v16, %v1890_v45  ;;  %v1902_v25 = vunpack.c.l.bf16 %v470_v17  ;;  %v1904_v26 = vunpack.c.h.bf16 %v470_v17  ;;  %v1324_v17 = vld [vmem:[#allocation8] sm:$0xff] }
  0xf5   : > { %v651_v27 = vmul.f32 0.796875, %v635_v18  ;;  %v652_v28 = vmul.f32 0.796875, %v636_v19  ;;  %v597_v29 = vunpack.c.l.bf16 %v588_v22  ;;  %v598_v30 = vunpack.c.h.bf16 %v588_v22  ;;  %v428_v31 = vpop.f32.mrf.mxu0  ;;  %v1332_v18 = vld [vmem:[#allocation8 + $0x40] sm:$0xff]  ;;  %982 = vmatpush.bf16.msra.mxu2 %v1324_v17 }
  0xf6   : > { %v549_v34 = vpack.c.bf16 %v536_v24, %v535_v23  ;;  %v497_v35 = vmul.f32 %v1902_v25, %v1902_v25  ;;  %v498_v36 = vmul.f32 %v1904_v26, %v1904_v26  ;;  %v429_v37 = vadd.f32 %v428_v31, %v1858_v61  ;;  %v457_v38 = vpop.f32.mrf.mxu1  ;;  %1011 = vmatpush.bf16.msra.mxu3 %v1332_v18 }
  0xf7   : > { %v667_v39 = vpack.c.bf16 %v652_v28, %v651_v27  ;;  %v613_v40 = vadd.f32 %v597_v29, %v1876_v20  ;;  %v614_v41 = vadd.f32 %v598_v30, %v1878_v21  ;;  %v458_v42 = vadd.f32 %v457_v38, %v1860_v62 }
  0xf8   : > { %v559_v43 = vunpack.c.l.bf16 %v549_v34  ;;  %v560_v46 = vunpack.c.h.bf16 %v549_v34  ;;  %v510_v49 = vpack.c.bf16 %v498_v36, %v497_v35 }
  0xf9   : > { %v675_v50 = vunpack.c.l.bf16 %v667_v39  ;;  %v628_v53 = vpack.c.bf16 %v614_v41, %v613_v40  ;;  %v471_v56 = vpack.c.bf16 %v458_v42, %v429_v37  ;;  %v676_v3 = vunpack.c.h.bf16 %v667_v39 }
  0xfa   : > { %v575_v63 = vmul.f32 0.044677734, %v559_v43  ;;  %v576_v0 = vmul.f32 0.044677734, %v560_v46  ;;  %v521_v1 = vunpack.c.l.bf16 %v510_v49  ;;  %v522_v2 = vunpack.c.h.bf16 %v510_v49 }
  0xfb   : > { %v637_v6 = vunpack.c.l.bf16 %v628_v53  ;;  %v638_v7 = vunpack.c.h.bf16 %v628_v53  ;;  %v1914_v8 = vunpack.c.l.bf16 %v471_v56  ;;  %1425 = vtanh.f32 %v675_v50 }
  0xfc   : > { %v589_v9 = vpack.c.bf16 %v576_v0, %v575_v63  ;;  %v537_v10 = vmul.f32 %v521_v1, %v1902_v25  ;;  %v538_v11 = vmul.f32 %v522_v2, %v1904_v26  ;;  %v1918_v14 = vunpack.c.h.bf16 %v471_v56 }
  0xfd   : > { %v653_v12 = vmul.f32 0.796875, %v637_v6  ;;  %v654_v13 = vmul.f32 0.796875, %v638_v7  ;;  %v499_v15 = vmul.f32 %v1914_v8, %v1914_v8  ;;  %v430_v16 = vpop.f32.mrf.mxu0  ;;  %1427 = vtanh.f32 %v676_v3 }
  0xfe   : > { %v599_v19 = vunpack.c.l.bf16 %v589_v9  ;;  %v600_v22 = vunpack.c.h.bf16 %v589_v9  ;;  %v550_v23 = vpack.c.bf16 %v538_v11, %v537_v10  ;;  %v431_v24 = vadd.f32 %v430_v16, %v1858_v61  ;;  %v459_v27 = vpop.f32.mrf.mxu1 }
  0xff   : > { %v668_v28 = vpack.c.bf16 %v654_v13, %v653_v12  ;;  %v500_v29 = vmul.f32 %v1918_v14, %v1918_v14  ;;  %v460_v30 = vadd.f32 %v459_v27, %v1860_v62 }
 0x100   : > { %v615_v31 = vadd.f32 %v599_v19, %v1888_v44  ;;  %v616_v32 = vadd.f32 %v600_v22, %v1890_v45  ;;  %v561_v33 = vunpack.c.l.bf16 %v550_v23  ;;  %v562_v34 = vunpack.c.h.bf16 %v550_v23 }
 0x101   : > { %v677_v35 = vunpack.c.l.bf16 %v668_v28  ;;  %v678_v36 = vunpack.c.h.bf16 %v668_v28  ;;  %v511_v37 = vpack.c.bf16 %v500_v29, %v499_v15  ;;  %v472_v38 = vpack.c.bf16 %v460_v30, %v431_v24  ;;  %v1426_v39 = vpop.eup %1425 }
 0x102   : > { %v629_v40 = vpack.c.bf16 %v616_v32, %v615_v31  ;;  %v577_v41 = vmul.f32 0.044677734, %v561_v33  ;;  %v578_v42 = vmul.f32 0.044677734, %v562_v34 }
 0x103   : > { %1429 = vtanh.f32 %v677_v35  ;;  %v523_v43 = vunpack.c.l.bf16 %v511_v37  ;;  %v524_v46 = vunpack.c.h.bf16 %v511_v37  ;;  %v1928_v49 = vunpack.c.l.bf16 %v472_v38  ;;  %v1428_v59 = vpop.eup %1427 }
 0x104   : > { %1431 = vtanh.f32 %v678_v36  ;;  %v639_v50 = vunpack.c.l.bf16 %v629_v40  ;;  %v640_v53 = vunpack.c.h.bf16 %v629_v40  ;;  %v590_v56 = vpack.c.bf16 %v578_v42, %v577_v41 }
 0x105   : > { %v539_v60 = vmul.f32 %v523_v43, %v1914_v8  ;;  %v540_v63 = vmul.f32 %v524_v46, %v1918_v14  ;;  %v1932_v0 = vunpack.c.h.bf16 %v472_v38  ;;  %v501_v1 = vmul.f32 %v1928_v49, %v1928_v49  ;;  %v433_v2 = vpop.f32.mrf.mxu0 }
 0x106   : > { %v655_v3 = vmul.f32 0.796875, %v639_v50  ;;  %v656_v6 = vmul.f32 0.796875, %v640_v53  ;;  %v601_v7 = vunpack.c.l.bf16 %v590_v56  ;;  %v602_v9 = vunpack.c.h.bf16 %v590_v56  ;;  %v462_v10 = vpop.f32.mrf.mxu1 }
 0x107   : > { %v551_v11 = vpack.c.bf16 %v540_v63, %v539_v60  ;;  %v502_v12 = vmul.f32 %v1932_v0, %v1932_v0  ;;  %v434_v13 = vadd.f32 %v433_v2, %v1858_v61  ;;  %v463_v15 = vadd.f32 %v462_v10, %v1860_v62 }
 0x108   : > { %v669_v16 = vpack.c.bf16 %v656_v6, %v655_v3  ;;  %v617_v17 = vadd.f32 %v601_v7, %v1902_v25  ;;  %v618_v18 = vadd.f32 %v602_v9, %v1904_v26  ;;  %v1942_v19 = vpack.c.bf16 %v1428_v59, %v1426_v39 }
 0x109   : > { %v1430_v22 = vpop.eup %1429  ;;  %v563_v23 = vunpack.c.l.bf16 %v551_v11  ;;  %v564_v24 = vunpack.c.h.bf16 %v551_v11  ;;  %v512_v27 = vpack.c.bf16 %v502_v12, %v501_v1  ;;  %v473_v28 = vpack.c.bf16 %v463_v15, %v434_v13 }
 0x10a   : > { %v1432_v29 = vpop.eup %1431  ;;  %v679_v30 = vunpack.c.l.bf16 %v669_v16  ;;  %v680_v31 = vunpack.c.h.bf16 %v669_v16  ;;  %v630_v32 = vpack.c.bf16 %v618_v18, %v617_v17  ;;  %v715_v33 = vunpack.c.l.bf16 %v1942_v19 }
 0x10b   : > { %v579_v34 = vmul.f32 0.044677734, %v563_v23  ;;  %v580_v35 = vmul.f32 0.044677734, %v564_v24  ;;  %v525_v36 = vunpack.c.l.bf16 %v512_v27  ;;  %v526_v37 = vunpack.c.h.bf16 %v512_v27 }
 0x10c   : > { %1433 = vtanh.f32 %v679_v30  ;;  %v641_v38 = vunpack.c.l.bf16 %v630_v32  ;;  %v642_v40 = vunpack.c.h.bf16 %v630_v32  ;;  %v1945_v39 = vunpack.c.l.bf16 %v473_v28 }
 0x10d   : > { %1435 = vtanh.f32 %v680_v31  ;;  %v591_v41 = vpack.c.bf16 %v580_v35, %v579_v34  ;;  %v541_v42 = vmul.f32 %v525_v36, %v1928_v49  ;;  %v542_v43 = vmul.f32 %v526_v37, %v1932_v0  ;;  %v435_v46 = vpop.f32.mrf.mxu0 }
 0x10e   : > { %v657_v50 = vmul.f32 0.796875, %v641_v38  ;;  %v658_v53 = vmul.f32 0.796875, %v642_v40  ;;  %v1949_v56 = vunpack.c.h.bf16 %v473_v28  ;;  %v503_v59 = vmul.f32 %v1945_v39, %v1945_v39  ;;  %v464_v60 = vpop.f32.mrf.mxu1 }
 0x10f   : > { %v603_v63 = vunpack.c.l.bf16 %v591_v41  ;;  %v604_v1 = vunpack.c.h.bf16 %v591_v41  ;;  %v552_v2 = vpack.c.bf16 %v542_v43, %v541_v42  ;;  %v436_v3 = vadd.f32 %v435_v46, %v1858_v61 }
 0x110   : > { %v670_v6 = vpack.c.bf16 %v658_v53, %v657_v50  ;;  %v504_v7 = vmul.f32 %v1949_v56, %v1949_v56  ;;  %v465_v9 = vadd.f32 %v464_v60, %v1860_v62  ;;  %v708_v10 = vpack.c.bf16 %v1432_v29, %v1430_v22 }
 0x111   : > { %v619_v11 = vadd.f32 %v603_v63, %v1914_v8  ;;  %v620_v12 = vadd.f32 %v604_v1, %v1918_v14  ;;  %v565_v13 = vunpack.c.l.bf16 %v552_v2  ;;  %v566_v15 = vunpack.c.h.bf16 %v552_v2 }
 0x112   : > { %v1959_v16 = vpop.eup %1433  ;;  %v681_v17 = vunpack.c.l.bf16 %v670_v6  ;;  %v682_v18 = vunpack.c.h.bf16 %v670_v6  ;;  %v513_v23 = vpack.c.bf16 %v504_v7, %v503_v59  ;;  %v474_v24 = vpack.c.bf16 %v465_v9, %v436_v3 }
 0x113   : > { %v1436_v61 = vpop.eup %1435  ;;  %v631_v27 = vpack.c.bf16 %v620_v12, %v619_v11  ;;  %v581_v28 = vmul.f32 0.044677734, %v565_v13  ;;  %v582_v30 = vmul.f32 0.044677734, %v566_v15  ;;  %v716_v31 = vunpack.c.h.bf16 %v1942_v19 }
 0x114   : > { %1437 = vtanh.f32 %v681_v17  ;;  %v527_v62 = vunpack.c.l.bf16 %v513_v23  ;;  %v528_v22 = vunpack.c.h.bf16 %v513_v23  ;;  %v1962_v29 = vunpack.c.l.bf16 %v474_v24 }
 0x115   : > { %1439 = vtanh.f32 %v682_v18  ;;  %v643_v32 = vunpack.c.l.bf16 %v631_v27  ;;  %v644_v34 = vunpack.c.h.bf16 %v631_v27  ;;  %v592_v35 = vpack.c.bf16 %v582_v30, %v581_v28 }
 0x116   : > { %v543_v36 = vmul.f32 %v527_v62, %v1945_v39  ;;  %v544_v37 = vmul.f32 %v528_v22, %v1949_v56  ;;  %v1966_v38 = vunpack.c.h.bf16 %v474_v24  ;;  %v505_v40 = vmul.f32 %v1962_v29, %v1962_v29 }
 0x117   : > { %v659_v41 = vmul.f32 0.796875, %v643_v32  ;;  %v660_v42 = vmul.f32 0.796875, %v644_v34  ;;  %v605_v43 = vunpack.c.l.bf16 %v592_v35  ;;  %v606_v46 = vunpack.c.h.bf16 %v592_v35 }
 0x118   : > { %v553_v50 = vpack.c.bf16 %v544_v37, %v543_v36  ;;  %v506_v53 = vmul.f32 %v1966_v38, %v1966_v38  ;;  %v717_v59 = vunpack.c.l.bf16 %v708_v10  ;;  %v718_v60 = vunpack.c.h.bf16 %v708_v10 }
 0x119   : > { %v671_v63 = vpack.c.bf16 %v660_v42, %v659_v41  ;;  %v621_v1 = vadd.f32 %v605_v43, %v1928_v49  ;;  %v622_v2 = vadd.f32 %v606_v46, %v1932_v0  ;;  %v731_v3 = vadd.f32 1.0, %v715_v33 }
 0x11a   : > { %v1438_v6 = vpop.eup %1437  ;;  %v567_v7 = vunpack.c.l.bf16 %v553_v50  ;;  %v568_v9 = vunpack.c.h.bf16 %v553_v50  ;;  %v514_v11 = vpack.c.bf16 %v506_v53, %v505_v40  ;;  %v732_v12 = vadd.f32 1.0, %v716_v31 }
 0x11b   : > { %v1440_v13 = vpop.eup %1439  ;;  %v683_v15 = vunpack.c.l.bf16 %v671_v63  ;;  %v684_v17 = vunpack.c.h.bf16 %v671_v63  ;;  %v632_v18 = vpack.c.bf16 %v622_v2, %v621_v1  ;;  %v733_v23 = vadd.f32 1.0, %v717_v59 }
 0x11c   : > { %v583_v24 = vmul.f32 0.044677734, %v567_v7  ;;  %v584_v10 = vmul.f32 0.044677734, %v568_v9  ;;  %v529_v27 = vunpack.c.l.bf16 %v514_v11  ;;  %v530_v28 = vunpack.c.h.bf16 %v514_v11 }
 0x11d   : > { %1441 = vtanh.f32 %v683_v15  ;;  %v645_v30 = vunpack.c.l.bf16 %v632_v18  ;;  %v646_v62 = vunpack.c.h.bf16 %v632_v18  ;;  %v734_v22 = vadd.f32 1.0, %v718_v60 }
 0x11e   : > { %1443 = vtanh.f32 %v684_v17  ;;  %v593_v19 = vpack.c.bf16 %v584_v10, %v583_v24  ;;  %v545_v33 = vmul.f32 %v529_v27, %v1962_v29  ;;  %v546_v32 = vmul.f32 %v530_v28, %v1966_v38 }
 0x11f   : > { %v661_v31 = vmul.f32 0.796875, %v645_v30  ;;  %v662_v34 = vmul.f32 0.796875, %v646_v62  ;;  %v747_v35 = vpack.c.bf16 %v732_v12, %v731_v3  ;;  %v748_v36 = vpack.c.bf16 %v734_v22, %v733_v23 }
 0x120   : > { %v607_v37 = vunpack.c.l.bf16 %v593_v19  ;;  %v608_v40 = vunpack.c.h.bf16 %v593_v19  ;;  %v554_v41 = vpack.c.bf16 %v546_v32, %v545_v33  ;;  %v709_v42 = vpack.c.bf16 %v1436_v61, %v1959_v16 }
 0x121   : > { %v672_v43 = vpack.c.bf16 %v662_v34, %v661_v31  ;;  %v755_v46 = vunpack.c.l.bf16 %v747_v35  ;;  %v756_v50 = vunpack.c.h.bf16 %v747_v35  ;;  %v757_v53 = vunpack.c.l.bf16 %v748_v36 }
 0x122   : > { %v623_v59 = vadd.f32 %v607_v37, %v1945_v39  ;;  %v624_v60 = vadd.f32 %v608_v40, %v1949_v56  ;;  %v569_v63 = vunpack.c.l.bf16 %v554_v41  ;;  %v570_v1 = vunpack.c.h.bf16 %v554_v41 }
 0x123   : > { %v1442_v2 = vpop.eup %1441  ;;  %v685_v7 = vunpack.c.l.bf16 %v672_v43  ;;  %v686_v9 = vunpack.c.h.bf16 %v672_v43  ;;  %v758_v3 = vunpack.c.h.bf16 %v748_v36  ;;  %v771_v11 = vmul.f32 0.5, %v755_v46 }
 0x124   : > { %v1444_v12 = vpop.eup %1443  ;;  %v633_v15 = vpack.c.bf16 %v624_v60, %v623_v59  ;;  %v585_v17 = vmul.f32 0.044677734, %v569_v63  ;;  %v586_v18 = vmul.f32 0.044677734, %v570_v1  ;;  %v772_v16 = vmul.f32 0.5, %v756_v50 }
 0x125   : > { %1445 = vtanh.f32 %v685_v7  ;;  %v773_v61 = vmul.f32 0.5, %v757_v53  ;;  %v774_v23 = vmul.f32 0.5, %v758_v3  ;;  %v710_v24 = vpack.c.bf16 %v1440_v13, %v1438_v6 }
 0x126   : > { %1447 = vtanh.f32 %v686_v9  ;;  %v647_v10 = vunpack.c.l.bf16 %v633_v15  ;;  %v648_v27 = vunpack.c.h.bf16 %v633_v15  ;;  %v594_v28 = vpack.c.bf16 %v586_v18, %v585_v17 }
 0x127   : > { %v787_v30 = vpack.c.bf16 %v772_v16, %v771_v11  ;;  %v788_v62 = vpack.c.bf16 %v774_v23, %v773_v61  ;;  %v719_v22 = vunpack.c.l.bf16 %v709_v42  ;;  %v720_v19 = vunpack.c.h.bf16 %v709_v42 }
 0x128   : > { %v663_v33 = vmul.f32 0.796875, %v647_v10  ;;  %v664_v32 = vmul.f32 0.796875, %v648_v27  ;;  %v609_v31 = vunpack.c.l.bf16 %v594_v28  ;;  %v610_v34 = vunpack.c.h.bf16 %v594_v28 }
 0x129   : > { %v795_v35 = vunpack.c.l.bf16 %v787_v30  ;;  %v797_v36 = vunpack.c.l.bf16 %v788_v62  ;;  %v796_v37 = vunpack.c.h.bf16 %v787_v30  ;;  %v798_v40 = vunpack.c.h.bf16 %v788_v62 }
 0x12a   : > { %v673_v41 = vpack.c.bf16 %v664_v32, %v663_v33  ;;  %v625_v43 = vadd.f32 %v609_v31, %v1962_v29  ;;  %v626_v6 = vadd.f32 %v610_v34, %v1966_v38  ;;  %v721_v13 = vunpack.c.l.bf16 %v710_v24 }
 0x12b   : > { %v1446_v46 = vpop.eup %1445  ;;  %v811_v50 = vmul.f32 %v795_v35, %v1864_v4  ;;  %v813_v53 = vmul.f32 %v797_v36, %v1876_v20  ;;  %v812_v42 = vmul.f32 %v796_v37, %v1866_v5  ;;  %v814_v59 = vmul.f32 %v798_v40, %v1878_v21 }
 0x12c   : > { %v1448_v60 = vpop.eup %1447  ;;  %v687_v63 = vunpack.c.l.bf16 %v673_v41  ;;  %v688_v1 = vunpack.c.h.bf16 %v673_v41  ;;  %v634_v7 = vpack.c.bf16 %v626_v6, %v625_v43  ;;  %v722_v9 = vunpack.c.h.bf16 %v710_v24 }
 0x12d   : > { %v827_v3 = vpack.c.bf16 %v813_v53, %v811_v50  ;;  %v828_v11 = vpack.c.bf16 %v814_v59, %v812_v42  ;;  %v735_v15 = vadd.f32 1.0, %v719_v22  ;;  %v736_v17 = vadd.f32 1.0, %v720_v19 }
 0x12e   : > { %1449 = vtanh.f32 %v687_v63  ;;  %v649_v18 = vunpack.c.l.bf16 %v634_v7  ;;  %v650_v16 = vunpack.c.h.bf16 %v634_v7  ;;  %v737_v61 = vadd.f32 1.0, %v721_v13 }
 0x12f   : > { %1451 = vtanh.f32 %v688_v1  ;;  %983 = vmatmul.bf16.vlgmr.msra.gmra.mxu2 %v827_v3  ;;  %1012 = vmatmul.bf16.vlgmr.msra.gmra.mxu3 %v828_v11  ;;  %v738_v4 = vadd.f32 1.0, %v722_v9  ;;  %v749_v5 = vpack.c.bf16 %v736_v17, %v735_v15  ;;  %v711_v20 = vpack.c.bf16 %v1444_v12, %v1442_v2 }
 0x130   : > { %v665_v21 = vmul.f32 0.796875, %v649_v18  ;;  %v666_v23 = vmul.f32 0.796875, %v650_v16  ;;  %v712_v10 = vpack.c.bf16 %v1448_v60, %v1446_v46 }
 0x131   : > { %v750_v27 = vpack.c.bf16 %v738_v4, %v737_v61  ;;  %v759_v28 = vunpack.c.l.bf16 %v749_v5  ;;  %v760_v24 = vunpack.c.h.bf16 %v749_v5  ;;  %v723_v30 = vunpack.c.l.bf16 %v711_v20 }
 0x132   : > { %v674_v62 = vpack.c.bf16 %v666_v23, %v665_v21  ;;  %v724_v22 = vunpack.c.h.bf16 %v711_v20  ;;  %v725_v19 = vunpack.c.l.bf16 %v712_v10  ;;  %v726_v33 = vunpack.c.h.bf16 %v712_v10 }
 0x133   : > { %v761_v32 = vunpack.c.l.bf16 %v750_v27  ;;  %v762_v31 = vunpack.c.h.bf16 %v750_v27  ;;  %v775_v34 = vmul.f32 0.5, %v759_v28  ;;  %v776_v35 = vmul.f32 0.5, %v760_v24 }
 0x134   : > { %v1450_v36 = vpop.eup %1449  ;;  %v689_v37 = vunpack.c.l.bf16 %v674_v62  ;;  %v690_v40 = vunpack.c.h.bf16 %v674_v62  ;;  %v739_v41 = vadd.f32 1.0, %v723_v30  ;;  %v740_v2 = vadd.f32 1.0, %v724_v22 }
 0x135   : > { %v1452_v12 = vpop.eup %1451  ;;  %v777_v43 = vmul.f32 0.5, %v761_v32  ;;  %v778_v6 = vmul.f32 0.5, %v762_v31  ;;  %v789_v13 = vpack.c.bf16 %v776_v35, %v775_v34  ;;  %v741_v46 = vadd.f32 1.0, %v725_v19 }
 0x136   : > { %1453 = vtanh.f32 %v689_v37  ;;  %v742_v50 = vadd.f32 1.0, %v726_v33  ;;  %v751_v53 = vpack.c.bf16 %v740_v2, %v739_v41  ;;  %v713_v7 = vpack.c.bf16 %v1452_v12, %v1450_v36 }
 0x137   : > { %1455 = vtanh.f32 %v690_v40  ;;  %v790_v42 = vpack.c.bf16 %v778_v6, %v777_v43  ;;  %v799_v59 = vunpack.c.l.bf16 %v789_v13  ;;  %v800_v60 = vunpack.c.h.bf16 %v789_v13 }
 0x138   : > { %v752_v63 = vpack.c.bf16 %v742_v50, %v741_v46  ;;  %v763_v1 = vunpack.c.l.bf16 %v751_v53  ;;  %v764_v11 = vunpack.c.h.bf16 %v751_v53  ;;  %v727_v10 = vunpack.c.l.bf16 %v713_v7 }
 0x139   : > { %v801_v9 = vunpack.c.l.bf16 %v790_v42  ;;  %v802_v3 = vunpack.c.h.bf16 %v790_v42  ;;  %v815_v18 = vmul.f32 %v799_v59, %v1888_v44  ;;  %v816_v61 = vmul.f32 %v800_v60, %v1890_v45 }
 0x13a   : > { %v765_v15 = vunpack.c.l.bf16 %v752_v63  ;;  %v766_v17 = vunpack.c.h.bf16 %v752_v63  ;;  %v779_v20 = vmul.f32 0.5, %v763_v1  ;;  %v780_v30 = vmul.f32 0.5, %v764_v11 }
 0x13b   : > { %v817_v16 = vmul.f32 %v801_v9, %v1902_v25  ;;  %v818_v4 = vmul.f32 %v802_v3, %v1904_v26  ;;  %v728_v62 = vunpack.c.h.bf16 %v713_v7  ;;  %v743_v19 = vadd.f32 1.0, %v727_v10 }
 0x13c   : > { %v1454_v5 = vpop.eup %1453  ;;  %v781_v21 = vmul.f32 0.5, %v765_v15  ;;  %v782_v23 = vmul.f32 0.5, %v766_v17  ;;  %v791_v25 = vpack.c.bf16 %v780_v30, %v779_v20 }
 0x13d   : > { %v1456_v27 = vpop.eup %1455  ;;  %v829_v28 = vpack.c.bf16 %v817_v16, %v815_v18  ;;  %v830_v24 = vpack.c.bf16 %v818_v4, %v816_v61  ;;  %v744_v32 = vadd.f32 1.0, %v728_v62  ;;  %v1424_v4 = vld [vmem:[%s2059_s4] ss:$0 sm:$0xff] }
 0x13e   : > { %v714_v22 = vpack.c.bf16 %v1456_v27, %v1454_v5  ;;  %v792_v44 = vpack.c.bf16 %v782_v23, %v781_v21  ;;  %v803_v36 = vunpack.c.l.bf16 %v791_v25  ;;  %v804_v37 = vunpack.c.h.bf16 %v791_v25 }
 0x13f   : > { %988 = vmatmul.bf16.gmra.mxu2 %v829_v28  ;;  %1017 = vmatmul.bf16.gmra.mxu3 %v830_v24  ;;  %v753_v40 = vpack.c.bf16 %v744_v32, %v743_v19  ;;  %v871_v5 = vadd.f32 %v1424_v4, %v1827_v47  ;;  %v873_v47 = vadd.f32 %v1424_v4, %v1835_v51 }
 0x140   : > { %v729_v33 = vunpack.c.l.bf16 %v714_v22  ;;  %v730_v45 = vunpack.c.h.bf16 %v714_v22  ;;  %v805_v26 = vunpack.c.l.bf16 %v792_v44  ;;  %v806_v31 = vunpack.c.h.bf16 %v792_v44 }
 0x141   : > { %v819_v13 = vmul.f32 %v803_v36, %v1914_v8  ;;  %v820_v46 = vmul.f32 %v804_v37, %v1918_v14  ;;  %v767_v50 = vunpack.c.l.bf16 %v753_v40  ;;  %v768_v53 = vunpack.c.h.bf16 %v753_v40 }
 0x142   : > { %v745_v34 = vadd.f32 1.0, %v729_v33  ;;  %v746_v35 = vadd.f32 1.0, %v730_v45  ;;  %v821_v2 = vmul.f32 %v805_v26, %v1928_v49  ;;  %v822_v12 = vmul.f32 %v806_v31, %v1932_v0 }
 0x143   : > { %v783_v1 = vmul.f32 0.5, %v767_v50  ;;  %v784_v7 = vmul.f32 0.5, %v768_v53  ;;  %v874_v22 = vadd.f32 %v1424_v4, %v1838_v52  ;;  %v875_v33 = vadd.f32 %v1424_v4, %v1843_v54 }
 0x144   : > { %v754_v41 = vpack.c.bf16 %v746_v35, %v745_v34  ;;  %v831_v42 = vpack.c.bf16 %v821_v2, %v819_v13  ;;  %v832_v59 = vpack.c.bf16 %v822_v12, %v820_v46  ;;  %v876_v31 = vadd.f32 %v1424_v4, %v1846_v55 }
 0x145   : > { %v793_v49 = vpack.c.bf16 %v784_v7, %v783_v1  ;;  %v877_v37 = vadd.f32 %v1424_v4, %v1851_v57  ;;  %v878_v12 = vadd.f32 %v1424_v4, %v1854_v58 }
 0x146   : > { %v769_v43 = vunpack.c.l.bf16 %v754_v41  ;;  %v770_v6 = vunpack.c.h.bf16 %v754_v41 }
 0x147   : > { %v807_v11 = vunpack.c.l.bf16 %v793_v49  ;;  %v808_v15 = vunpack.c.h.bf16 %v793_v49 }
 0x148   : > { %v785_v60 = vmul.f32 0.5, %v769_v43  ;;  %v786_v63 = vmul.f32 0.5, %v770_v6 }
 0x149   : > { %v823_v17 = vmul.f32 %v807_v11, %v1945_v39  ;;  %v824_v18 = vmul.f32 %v808_v15, %v1949_v56  ;;  %v872_v39 = vadd.f32 %v1424_v4, %v1830_v48 }
 0x14a   : > { %v794_v9 = vpack.c.bf16 %v786_v63, %v785_v60 }
 0x14c   : > { %v809_v3 = vunpack.c.l.bf16 %v794_v9  ;;  %v810_v0 = vunpack.c.h.bf16 %v794_v9 }
 0x14e   : > { %v825_v8 = vmul.f32 %v809_v3, %v1962_v29  ;;  %v826_v14 = vmul.f32 %v810_v0, %v1966_v38 }
 0x14f   : > { %993 = vmatmul.bf16.gmra.mxu2 %v831_v42  ;;  %1022 = vmatmul.bf16.gmra.mxu3 %v832_v59 }
 0x150   : > { %v833_v16 = vpack.c.bf16 %v825_v8, %v823_v17  ;;  %v834_v61 = vpack.c.bf16 %v826_v14, %v824_v18 }
 0x15f   : > { %998 = vmatmul.bf16.gmra.mxu2 %v833_v16  ;;  %1027 = vmatmul.bf16.gmra.mxu3 %v834_v61 }
 0x1b2   : > { %v984_v20 = vpop.f32.mrf.mxu2  ;;  %v1013_v21 = vpop.f32.mrf.mxu3 }
 0x1b3   : > { %v985_v23 = vadd.f32 %v984_v20, %v871_v5 }
 0x1b5   : > { %v1014_v29 = vadd.f32 %v1013_v21, %v985_v23 }
 0x1b7   : > { %1033 = vst [vmem:[%s2005_s12] sm:$0xff] %v1014_v29 }
 0x1ba   : > { %v986_v56 = vpop.f32.mrf.mxu2  ;;  %v1015_v38 = vpop.f32.mrf.mxu3 }
 0x1bb   : > { %v987_v10 = vadd.f32 %v986_v56, %v872_v39 }
 0x1bd   : > { %v1016_v27 = vadd.f32 %v1015_v38, %v987_v10 }
 0x1bf   : > { %1034 = vst [vmem:[%s2005_s12 + $0x8] sm:$0xff] %v1016_v27 }
 0x1c2   : > { %v989_v28 = vpop.f32.mrf.mxu2  ;;  %v1018_v24 = vpop.f32.mrf.mxu3 }
 0x1c3   : > { %v990_v30 = vadd.f32 %v989_v28, %v873_v47 }
 0x1c5   : > { %v1019_v62 = vadd.f32 %v1018_v24, %v990_v30 }
 0x1c7   : > { %1035 = vst [vmem:[%s2005_s12 + $0x10] sm:$0xff] %v1019_v62 }
 0x1ca   : > { %v991_v44 = vpop.f32.mrf.mxu2  ;;  %v1020_v19 = vpop.f32.mrf.mxu3 }
 0x1cb   : > { %v992_v48 = vadd.f32 %v991_v44, %v874_v22 }
 0x1cd   : > { %v1021_v25 = vadd.f32 %v1020_v19, %v992_v48 }
 0x1cf   : > { %1036 = vst [vmem:[%s2005_s12 + $0x18] sm:$0xff] %v1021_v25 }
 0x1d2   : > { %v994_v45 = vpop.f32.mrf.mxu2  ;;  %v1023_v32 = vpop.f32.mrf.mxu3 }
 0x1d3   : > { %v995_v51 = vadd.f32 %v994_v45, %v875_v33 }
 0x1d5   : > { %v1024_v26 = vadd.f32 %v1023_v32, %v995_v51 }
 0x1d7   : > { %1037 = vst [vmem:[%s2005_s12 + $0x20] sm:$0xff] %v1024_v26 }
 0x1da   : > { %v996_v34 = vpop.f32.mrf.mxu2  ;;  %v1025_v52 = vpop.f32.mrf.mxu3 }
 0x1db   : > { %v997_v35 = vadd.f32 %v996_v34, %v876_v31 }
 0x1dd   : > { %v1026_v36 = vadd.f32 %v1025_v52, %v997_v35 }
 0x1df   : > { %1038 = vst [vmem:[%s2005_s12 + $0x28] sm:$0xff] %v1026_v36 }
 0x1e2   : > { %v999_v40 = vpop.f32.mrf.mxu2  ;;  %v1028_v54 = vpop.f32.mrf.mxu3 }
 0x1e3   : > { %v1000_v41 = vadd.f32 %v999_v40, %v877_v37 }
 0x1e5   : > { %v1029_v2 = vadd.f32 %v1028_v54, %v1000_v41 }
 0x1e7   : > { %1039 = vst [vmem:[%s2005_s12 + $0x30] sm:$0xff] %v1029_v2 }
 0x1ea   : > { %v1001_v55 = vpop.f32.mrf.mxu2  ;;  %v1030_v43 = vpop.f32.mrf.mxu3 }
 0x1eb   : > { %v1002_v57 = vadd.f32 %v1001_v55, %v878_v12 }
 0x1ed   : > { %v1031_v6 = vadd.f32 %v1030_v43, %v1002_v57 }
 0x1ef   : > { %1040 = vst [vmem:[%s2005_s12 + $0x38] sm:$0xff] %v1031_v6 }
 0x1f0   : > { %1604 = shalt.err (!%p1601_p10)
}
 0x1f1   : > { %s1660_s26 = smov 128   ;;  %s1661_s29 = smov 8  }
 0x1f2   : > { %1355 = dma.vmem_to_hbm [thread:$0]  (%p1776_p0), %s1055_s15, 1024, %s1057_s7, %s1042_s16, %s1660_s26, %s1660_s26, %s1661_s29  }
 0x1f3 PF: > { %p1382_p11 = scmp.ge.s32.totalorder %s1651_s21, 2  ;;  %s1071_s12 = sand.u32 1, %s1639_s18  }
 0x1f4   : > { %s1072_s23 = scalar_lea.sflag [#allocation4], %s1071_s12 }
 0x1f5   : > { %p1372_p12 = pnand %p1382_p11, %p1727_p6 }
 0x1f7   : > { %p1373_p13 = pneg %p1372_p12 }
 0x1f9   : > { %1634 = dma.done.wait (%p1373_p13), %s1072_s23, 1024  }
 0x1fa   : > { %1636 = vsyncadd (%p1373_p13), %s1072_s23, 4294966272  ;;  %p20_p3 = scmp.ge.s32.totalorder %s1763_s30, 10   ;;  %s2069_s18 = smov %s1643_s19 }
 0x1fb   : > { %s2070_s19 = smov %s1647_s20  ;;  %s2071_s20 = smov %s1772_s9 }
 0x1fc   : > { %s2072_s21 = smov %s1763_s30  ;;  %22 = sbr.rel (!%p20_p3) target bundleno = 7 (0x7), region = 97 }
 0x201   :  { %1078 = vsyncpa [#allocation3], 1 }
 0x202   :  { %1080 = vsyncpa [#allocation3 + $0x1], 1 }
 0x203   :  { %1081 = vsyncpa [#allocation6], 1 }
 0x204   :  { %1082 = vsyncpa [#allocation9], 1 }
 0x205   :  { %1083 = vsyncpa [#allocation4], 1 }
 0x206   :  { %1085 = vsyncpa [#allocation4 + $0x1], 1 }

</bundles_post_ra>
